<compile_context>
chip_gen: v5e
topology: v5e:2x2
jax: 0.10.0
libtpu: 0.0.40
codegen_flags: <defaults>
</compile_context>

<pallas_src>
import jax
import jax.numpy as jnp
from jax.experimental import pallas as pl
from jax.experimental.pallas import tpu as pltpu  # noqa: F401  (kept for TPU-specific tuning hooks)


# --------------------------------------------------------------------------------------
# Fused TreeAttn kernel
# --------------------------------------------------------------------------------------

def _tree_attn_kernel(h_ref, enc_ref, wh_ref, we_ref, ba_ref, ws_ref, bs_ref,
                      mask_ref, o_ref):
    """All-in-one: projections -> tanh -> score -> mask -> softmax.

    h_ref   : (B, H)        hidden (dim-0 squeezed in the wrapper)
    enc_ref : (B*S, I)      encoder outputs, batch-major flattened (row = b*S + s)
    wh_ref  : (H, Hout)     attn weight rows acting on the `hidden` half of the concat
    we_ref  : (I, Hout)     attn weight rows acting on the encoder half of the concat
    ba_ref  : (1, Hout)     attn bias
    ws_ref  : (1, Hout)     score Linear(H, 1) weight (as a row)
    bs_ref  : (1, 1)        score bias
    mask_ref: (B, S)        nonzero => masked position
    o_ref   : (B, S)        softmax attention weights
    """
    B, _ = h_ref.shape
    BS, _ = enc_ref.shape
    S = BS // B
    Hout = wh_ref.shape[1]

    # Hidden projection: computed once per batch row instead of once per timestep.
    h_proj = jnp.dot(h_ref[...], wh_ref[...],
                     preferred_element_type=jnp.float32)               # (B, Hout)
    # Encoder projection for every (b, s) row in a single MXU matmul.
    e_proj = jnp.dot(enc_ref[...], we_ref[...],
                     preferred_element_type=jnp.float32)               # (B*S, Hout)

    # concat((hidden, enc)) @ W_attn^T + b_attn  ==  h_proj (broadcast over s) + e_proj + b
    feat = jnp.tanh(e_proj.reshape(B, S, Hout)
                    + h_proj[:, None, :]
                    + ba_ref[...])                                     # (B, S, Hout)

    # score Linear(Hout, 1): multiply by the weight row and reduce over the lane axis.
    energies = jnp.sum(feat * ws_ref[...], axis=-1) + bs_ref[...]      # (B, S)

    # masked_fill_(seq_mask, -1e12) followed by softmax over the sequence axis.
    energies = jnp.where(mask_ref[...] != 0, -1.0e12, energies)
    m = jnp.max(energies, axis=-1, keepdims=True)
    e = jnp.exp(energies - m)
    o_ref[...] = e / jnp.sum(e, axis=-1, keepdims=True)


def tree_attn_forward(params, hidden, encoder_outputs, seq_mask=None):
    """JAX/Pallas equivalent of TreeAttn.forward. Returns (B, 1, S)."""
    S, B, I = encoder_outputs.shape
    Hh = hidden.shape[-1]                      # feature dim of `hidden`
    Hout = params["w_attn"].shape[0]           # attn out features (= hidden_size)

    # nn.Linear stores weight as (out, in); split its transpose by the concat order
    # (hidden features first, encoder features second).
    w_attn_t = params["w_attn"].T.astype(jnp.float32)                  # (Hh + I, Hout)
    wh = w_attn_t[:Hh, :]
    we = w_attn_t[Hh:, :]
    ba = params["b_attn"].reshape(1, Hout).astype(jnp.float32)
    ws = params["w_score"].reshape(1, Hout).astype(jnp.float32)
    bs = params["b_score"].reshape(1, 1).astype(jnp.float32)

    hid2d = hidden.reshape(B, Hh).astype(jnp.float32)
    # batch-major flatten so the kernel never needs an in-kernel transpose
    enc_bm = jnp.transpose(encoder_outputs, (1, 0, 2)).reshape(B * S, I).astype(jnp.float32)
    if seq_mask is None:
        mask = jnp.zeros((B, S), jnp.float32)
    else:
        mask = seq_mask.reshape(B, S).astype(jnp.float32)

    attn = pl.pallas_call(
        _tree_attn_kernel,
        out_shape=jax.ShapeDtypeStruct((B, S), jnp.float32),
    )(hid2d, enc_bm, wh, we, ba, ws, bs, mask)

    return attn[:, None, :]                     # == attn_energies.unsqueeze(1) -> (B, 1, S)


# --------------------------------------------------------------------------------------
# Demo / self-check
# --------------------------------------------------------------------------------------

if __name__ == "__main__":
    S, B = 8, 4
    input_size = 32      # feature dim of encoder_outputs
    hidden_size = 32     # feature dim of hidden / attn output dim

    key = jax.random.PRNGKey(0)
    k1, k2, k3, k4, k5, k6 = jax.random.split(key, 6)

    hidden = 0.5 * jax.random.normal(k1, (1, B, hidden_size), jnp.float32)
    encoder_outputs = 0.5 * jax.random.normal(k2, (S, B, input_size), jnp.float32)
    lengths = jnp.array([8, 7, 5, 3], jnp.int32)
    # 1 (True) where the position is padding, matching masked_fill_(seq_mask.bool(), -1e12)
    seq_mask = (jnp.arange(S)[None, :] >= lengths[:, None]).astype(jnp.float32)   # (B, S)

    params = dict(
        w_attn=0.2 * jax.random.normal(k3, (hidden_size, hidden_size + input_size), jnp.float32),
        b_attn=0.2 * jax.random.normal(k4, (hidden_size,), jnp.float32),
        w_score=0.2 * jax.random.normal(k5, (1, hidden_size), jnp.float32),
        b_score=0.2 * jax.random.normal(k6, (1,), jnp.float32),
    )

    out = tree_attn_forward(params, hidden, encoder_outputs, seq_mask)
    jax.block_until_ready(out)

    # Pure-JAX reference mirroring the PyTorch forward exactly.
    def reference(hid, enc, mask, p):
        S_, B_, I_ = enc.shape
        H_ = hid.shape[-1]
        hid_rep = jnp.broadcast_to(hid.reshape(1, B_, H_), (S_, B_, H_))
        energy_in = jnp.concatenate([hid_rep, enc], axis=2).reshape(-1, H_ + I_)
        feat = jnp.tanh(energy_in @ p["w_attn"].T + p["b_attn"])
        en = (feat @ p["w_score"].T + p["b_score"]).reshape(S_, B_).T     # (B, S)
        en = jnp.where(mask.astype(bool), -1.0e12, en)
        en = jax.nn.softmax(en, axis=1)
        return en[:, None, :]

    expected = reference(hidden, encoder_outputs, seq_mask, params)

    assert out.shape == (B, 1, S)
    max_err = float(jnp.max(jnp.abs(out - expected)))
    assert jnp.allclose(out, expected, atol=1e-5, rtol=1e-5), f"max_err={max_err}"
    # each row sums to 1
    assert jnp.allclose(jnp.sum(out, axis=-1), 1.0, atol=1e-5)

    print("KERNEL_OK")
</pallas_src>

<mosaic_0001>
module attributes {stable_mosaic.version = 11 : i64} {
  func.func @_tree_attn_kernel(%arg0: memref<4x32xf32, #tpu.memory_space<vmem>>, %arg1: memref<32x32xf32, #tpu.memory_space<vmem>>, %arg2: memref<32x32xf32, #tpu.memory_space<vmem>>, %arg3: memref<32x32xf32, #tpu.memory_space<vmem>>, %arg4: memref<1x32xf32, #tpu.memory_space<vmem>>, %arg5: memref<1x32xf32, #tpu.memory_space<vmem>>, %arg6: memref<1x1xf32, #tpu.memory_space<vmem>>, %arg7: memref<4x8xf32, #tpu.memory_space<vmem>>, %arg8: memref<4x8xf32, #tpu.memory_space<vmem>>) attributes {dimension_semantics = [], scalar_prefetch = 0 : i64, scratch_operands = 0 : i64, tpu.core_type = #tpu.core_type<tc>} {
    %c0 = arith.constant 0 : index
    %c0_0 = arith.constant 0 : index
    %0 = vector.load %arg0[%c0, %c0_0] : memref<4x32xf32, #tpu.memory_space<vmem>>, vector<4x32xf32>
    %c0_1 = arith.constant 0 : index
    %c0_2 = arith.constant 0 : index
    %1 = vector.load %arg2[%c0_1, %c0_2] : memref<32x32xf32, #tpu.memory_space<vmem>>, vector<32x32xf32>
    %cst = arith.constant dense<0.000000e+00> : vector<4x32xf32>
    %2 = tpu.matmul %0, %1, %cst {dimension_numbers = #tpu.dot_dimension_numbers<[1], [0], [0], [1], [0, 0, 1, 1], [], []>} : vector<4x32xf32>, vector<32x32xf32>, vector<4x32xf32> -> vector<4x32xf32>
    %c0_3 = arith.constant 0 : index
    %c0_4 = arith.constant 0 : index
    %3 = vector.load %arg1[%c0_3, %c0_4] : memref<32x32xf32, #tpu.memory_space<vmem>>, vector<32x32xf32>
    %c0_5 = arith.constant 0 : index
    %c0_6 = arith.constant 0 : index
    %4 = vector.load %arg3[%c0_5, %c0_6] : memref<32x32xf32, #tpu.memory_space<vmem>>, vector<32x32xf32>
    %cst_7 = arith.constant dense<0.000000e+00> : vector<32x32xf32>
    %5 = tpu.matmul %3, %4, %cst_7 {dimension_numbers = #tpu.dot_dimension_numbers<[1], [0], [0], [1], [0, 0, 1, 1], [], []>} : vector<32x32xf32>, vector<32x32xf32>, vector<32x32xf32> -> vector<32x32xf32>
    %6 = vector.shape_cast %5 : vector<32x32xf32> to vector<4x8x32xf32>
    %7 = vector.shape_cast %2 : vector<4x32xf32> to vector<4x1x32xf32>
    %8 = vector.broadcast %7 : vector<4x1x32xf32> to vector<4x8x32xf32>
    %9 = arith.addf %6, %8 : vector<4x8x32xf32>
    %c0_8 = arith.constant 0 : index
    %c0_9 = arith.constant 0 : index
    %10 = vector.load %arg4[%c0_8, %c0_9] : memref<1x32xf32, #tpu.memory_space<vmem>>, vector<1x32xf32>
    %11 = vector.shape_cast %10 : vector<1x32xf32> to vector<1x1x32xf32>
    %12 = vector.broadcast %11 : vector<1x1x32xf32> to vector<4x8x32xf32>
    %13 = arith.addf %9, %12 : vector<4x8x32xf32>
    %14 = math.tanh %13 : vector<4x8x32xf32>
    %c0_10 = arith.constant 0 : index
    %c0_11 = arith.constant 0 : index
    %15 = vector.load %arg5[%c0_10, %c0_11] : memref<1x32xf32, #tpu.memory_space<vmem>>, vector<1x32xf32>
    %16 = vector.shape_cast %15 : vector<1x32xf32> to vector<1x1x32xf32>
    %17 = vector.broadcast %16 : vector<1x1x32xf32> to vector<4x8x32xf32>
    %18 = arith.mulf %14, %17 : vector<4x8x32xf32>
    %cst_12 = arith.constant dense<0.000000e+00> : vector<4x8xf32>
    %19 = vector.multi_reduction <add>, %18, %cst_12 [2] : vector<4x8x32xf32> to vector<4x8xf32>
    %c0_13 = arith.constant 0 : index
    %c0_14 = arith.constant 0 : index
    %20 = vector.load %arg6[%c0_13, %c0_14] : memref<1x1xf32, #tpu.memory_space<vmem>>, vector<1x1xf32>
    %21 = vector.broadcast %20 : vector<1x1xf32> to vector<4x8xf32>
    %22 = arith.addf %19, %21 : vector<4x8xf32>
    %c0_15 = arith.constant 0 : index
    %c0_16 = arith.constant 0 : index
    %23 = vector.load %arg7[%c0_15, %c0_16] : memref<4x8xf32, #tpu.memory_space<vmem>>, vector<4x8xf32>
    %cst_17 = arith.constant 0.000000e+00 : f32
    %24 = vector.broadcast %cst_17 : f32 to vector<4x8xf32>
    %25 = arith.cmpf one, %23, %24 : vector<4x8xf32>
    %cst_18 = arith.constant -9.99999995E+11 : f32
    %26 = vector.broadcast %cst_18 : f32 to vector<4x8xf32>
    %27 = arith.select %25, %26, %22 : vector<4x8xi1>, vector<4x8xf32>
    %cst_19 = arith.constant dense<0xFF800000> : vector<4xf32>
    %28 = vector.multi_reduction <maximumf>, %27, %cst_19 [1] : vector<4x8xf32> to vector<4xf32>
    %29 = vector.shape_cast %28 : vector<4xf32> to vector<4x1xf32>
    %30 = vector.broadcast %29 : vector<4x1xf32> to vector<4x8xf32>
    %31 = arith.subf %27, %30 : vector<4x8xf32>
    %32 = math.exp %31 : vector<4x8xf32>
    %cst_20 = arith.constant dense<0.000000e+00> : vector<4xf32>
    %33 = vector.multi_reduction <add>, %32, %cst_20 [1] : vector<4x8xf32> to vector<4xf32>
    %34 = vector.shape_cast %33 : vector<4xf32> to vector<4x1xf32>
    %35 = vector.broadcast %34 : vector<4x1xf32> to vector<4x8xf32>
    %36 = arith.divf %32, %35 : vector<4x8xf32>
    %c0_21 = arith.constant 0 : index
    %c0_22 = arith.constant 0 : index
    %37 = vector.load %arg8[%c0_21, %c0_22] : memref<4x8xf32, #tpu.memory_space<vmem>>, vector<4x8xf32>
    tpu.vector_store %arg8[%c0_21, %c0_22], %36 {strides = array<i32>} : memref<4x8xf32, #tpu.memory_space<vmem>>, vector<4x8xf32>,
    return
  }
}

</mosaic_0001>

<bundles_post_ra>
// kernel: tpu_custom_call.1
= control target key start
LH: loop header
LB: loop body
LE: loop exit
PB: predicated region body
PF: predicated region fallthrough
CT: control target
= control target key end

     0   :  { %s553_s0 = inlined_call_operand.hbm [shape: f32[4,32], index: 0, kind: input, shape index: {}]   ;;  %s554_s1 = inlined_call_operand.hbm [shape: f32[32,32], index: 1, kind: input, shape index: {}]   ;;  %s555_s2 = inlined_call_operand.hbm [shape: f32[32,32], index: 2, kind: input, shape index: {}]   ;;  %s556_s3 = inlined_call_operand.hbm [shape: f32[32,32], index: 3, kind: input, shape index: {}]   ;;  %s557_s4 = inlined_call_operand.vmem [shape: f32[1,32], index: 4, kind: input, shape index: {}]   ;;  %s558_s5 = inlined_call_operand.vmem [shape: f32[1,32], index: 5, kind: input, shape index: {}]   ;;  %s559_s6 = inlined_call_operand.<no memory space> [shape: f32[1,1], index: 6, kind: input, shape index: {}]   ;;  %s560_s7 = inlined_call_operand.vmem [shape: f32[4,8], index: 7, kind: input, shape index: {}]   ;;  %s561_s8 = inlined_call_operand.hbm [shape: f32[4,8], index: 8, kind: output, shape index: {}]  }
   0x1   :  { %v13_v0 = vstv %s559_s6 }
   0x2   :  { %14 = vst [vmem:[#allocation2] sm:$0x1] %v13_v0 }
   0x3   :  { %15 = vsyncpa [#allocation4], 0 }
   0x4   :  { %16 = vsyncpa [#allocation7], 0 }
   0x5   :  { %17 = vsyncpa [#allocation10], 0  ;;  %s34_s9 = sshll.u32 %s554_s1, 4  ;;  %s35_s9 = int_to_ptr.hbm [resolvable:$true] %s34_s9 }
   0x6   :  { %18 = vsyncpa [#allocation5], 0  ;;  %s461_s10 = smov [#allocation6]   ;;  %s24_s14 = sshll.u32 %s553_s0, 4  ;;  %s25_s14 = int_to_ptr.hbm [resolvable:$true] %s24_s14 }
   0x7   :  { %s36_s11 = sshll.u32 %s461_s10, 4  ;;  %s462_s15 = smov 128   ;;  %s37_s11 = int_to_ptr.vmem [resolvable:$true] %s36_s11 }
   0x8   :  { %s463_s16 = smov 8   ;;  %s464_s6 = smov [#allocation3]  }
   0x9   :  { %42 = dma.hbm_to_vmem [thread:$0]  %s35_s9, 512, %s37_s11, [#allocation7], %s462_s15, %s462_s15, %s463_s16  }
   0xa   :  { %s26_s17 = sshll.u32 %s464_s6, 4  ;;  %s47_s20 = sshll.u32 %s555_s2, 4  ;;  %s27_s17 = int_to_ptr.vmem [resolvable:$true] %s26_s17  ;;  %s48_s20 = int_to_ptr.hbm [resolvable:$true] %s47_s20 }
   0xb   :  { %29 = dma.hbm_to_vmem [thread:$0]  %s25_s14, 64, %s27_s17, [#allocation4]  }
   0xc   :  { %s60_s22 = sshll.u32 %s556_s3, 4  ;;  %s465_s23 = smov [#allocation8]   ;;  %s61_s22 = int_to_ptr.hbm [resolvable:$true] %s60_s22 }
   0xd   :  { %s49_s24 = sshll.u32 %s465_s23, 4  ;;  %s466_s0 = smov [#allocation9]   ;;  %s50_s24 = int_to_ptr.vmem [resolvable:$true] %s49_s24 }
   0xe   :  { %55 = dma.hbm_to_vmem [thread:$0]  %s48_s20, 512, %s50_s24, [#allocation7], %s462_s15, %s462_s15, %s463_s16  }
   0xf   :  { %s62_s25 = sshll.u32 %s466_s0, 4  ;;  %s63_s25 = int_to_ptr.vmem [resolvable:$true] %s62_s25 }
  0x10   :  { %68 = dma.hbm_to_vmem [thread:$0]  %s61_s22, 512, %s63_s25, [#allocation10], %s462_s15, %s462_s15, %s463_s16  }
  0x11   :  { %453 = dma.done.wait [#allocation4], 64  }
  0x12   :  { %454 = vsyncadd [#allocation4], 4294967232 }
  0x13   :  { %455 = dma.done.wait [#allocation7], 1024  }
  0x14   :  { %456 = vsyncadd [#allocation7], 4294966272 }
  0x15   :  { %457 = dma.done.wait [#allocation10], 512  }
  0x16   :  { %458 = vsyncadd [#allocation10], 4294966784  ;;  %v97_v1 = vld [vmem:[#allocation8 + $0x18] sm:$0xff]  ;;  %v96_v3 = vld [vmem:[#allocation8 + $0x10] sm:$0xff]  ;;  %vm98_vm0 = vcmask 261120   ;;  %v467_v14 = vmov 0   ;;  %v236_v52 = vlaneseq }
  0x17   :  { %v129_v2 = vld [vmem:[#allocation9 + $0x18] sm:$0xff]  ;;  %114 = vmatpush.msra.mxu0 %v97_v1  ;;  %v128_v4 = vld [vmem:[#allocation9 + $0x10] sm:$0xff]  ;;  %v95_v5 = vld [vmem:[#allocation8 + $0x8] sm:$0xff]  ;;  %316 = vset.pattern.permute.xlu1 %v467_v14  ;;  %vm242_vm1 = vcmask 1041409   ;;  %vm244_vm2 = vcmask 1042434   ;;  %vm246_vm3 = vcmask 1043459  }
  0x18   :  { %300 = vmatpush.msra.mxu2 %v129_v2  ;;  %301 = vmatpush.msra.mxu3 %v129_v2  ;;  %v127_v6 = vld [vmem:[#allocation9 + $0x8] sm:$0xff]  ;;  %v94_v7 = vld [vmem:[#allocation8] sm:$0xff]  ;;  %v93_v9 = vld [vmem:[#allocation3] sm:$0xf]  ;;  %v237_v54 = vand.u32 127, %v236_v52  ;;  %vm250_vm5 = vcmask 60416  }
  0x19   :  { %154 = vmatpush.msra.mxu1 %v129_v2  ;;  %115 = vmatpush.msra.mxu0 %v96_v3  ;;  %v126_v8 = vld [vmem:[#allocation9] sm:$0xff]  ;;  %v123_v10 = vld [vmem:[#allocation6 + $0x8] sm:$0xff]  ;;  %v124_v11 = vld [vmem:[#allocation6 + $0x10] sm:$0xff]  ;;  %s283_s9 = sshll.u32 %s561_s8, 4  ;;  %s284_s9 = int_to_ptr.hbm [resolvable:$true] %s283_s9 }
  0x1a   :  { %302 = vmatpush.msra.mxu2 %v128_v4  ;;  %303 = vmatpush.msra.mxu3 %v128_v4  ;;  %v122_v12 = vld [vmem:[#allocation6] sm:$0xff]  ;;  %v125_v13 = vld [vmem:[#allocation6 + $0x18] sm:$0xff] }
  0x1b   :  { %155 = vmatpush.msra.mxu1 %v128_v4  ;;  %116 = vmatpush.msra.mxu0 %v95_v5  ;;  %v318_v19 = vld [vmem:[%s557_s4] ss:$0 sm:$0xff] }
  0x1c   :  { %304 = vmatpush.msra.mxu2 %v127_v6  ;;  %305 = vmatpush.msra.mxu3 %v127_v6  ;;  %v319_v32 = vld [vmem:[%s558_s5] ss:$0 sm:$0xff] }
  0x1d   :  { %156 = vmatpush.msra.mxu1 %v127_v6  ;;  %117 = vmatpush.msra.mxu0 %v94_v7  ;;  %v320_v49 = vld [vmem:[#allocation2] ss:$0 sm:$0xff] }
  0x1e   :  { %306 = vmatpush.msra.mxu2 %v126_v8  ;;  %307 = vmatpush.msra.mxu3 %v126_v8  ;;  %v230_v61 = vld [vmem:[%s560_s7] sm:$0xf]  ;;  %s468_s7 = smov [#allocation11]  }
  0x1f   :  { %295 = vmatmul.msk.f32.vlgmr.msra.gmra.mxu0 %vm98_vm0, %v93_v9  ;;  %297 = vmatmul.msk.f32.vlgmr.msra.gmra.mxu2 %vm98_vm0, %v123_v10  ;;  %vm231_vm4 = vcmp.ne.f32.partialorder %v230_v61, 0.0  ;;  %s281_s28 = sshll.u32 %s468_s7, 4  ;;  %s282_s28 = int_to_ptr.vmem [resolvable:$true] %s281_s28 }
  0x20   :  { %298 = vmatmul.msk.f32.vlgmr.msra.gmra.mxu3 %vm98_vm0, %v124_v11  ;;  %157 = vmatpush.msra.mxu1 %v126_v8 }
  0x21   :  { %296 = vmatmul.msk.f32.vlgmr.msra.gmra.mxu1 %vm98_vm0, %v122_v12  ;;  %317 = vset.pattern.permute.xlu0 %v467_v14 }
  0x28   :  { %299 = vmatmul.msk.f32.gmra.mxu3 %vm98_vm0, %v125_v13 }
  0x9c   :  { %v119_v15 = vpop.f32.mrf.mxu0 }
  0x9d   :  { %v175_v16 = vperm.slane %v119_v15, 0  ;;  %v172_v17 = vrot.slane %v119_v15, 1  ;;  %v173_v18 = vrot.slane %v119_v15, 2  ;;  %v174_v31 = vrot.slane %v119_v15, 3 }
  0x9e   :  { %v159_v20 = vpop.f32.mrf.mxu1 }
  0x9f   :  { %v183_v21 = vadd.f32 %v175_v16, %v159_v20  ;;  %v176_v22 = vperm.slane %v172_v17, 0  ;;  %v177_v23 = vperm.slane %v173_v18, 0  ;;  %v178_v34 = vperm.slane %v174_v31, 0 }
  0xa1   :  { %v191_v24 = vadd.f32 %v318_v19, %v183_v21 }
  0xa2   :  { %v162_v25 = vpop.f32.mrf.mxu2 }
  0xa3   :  { %v165_v26 = vpop.f32.mrf.mxu3  ;;  %321 = vtanh.f32 %v191_v24  ;;  %v184_v27 = vadd.f32 %v176_v22, %v162_v25 }
  0xa4   :  { %v185_v28 = vadd.f32 %v177_v23, %v165_v26 }
  0xa5   :  { %v192_v29 = vadd.f32 %v318_v19, %v184_v27 }
  0xa6   :  { %v193_v30 = vadd.f32 %v318_v19, %v185_v28 }
  0xa7   :  { %323 = vtanh.f32 %v192_v29 }
  0xa8   :  { %325 = vtanh.f32 %v193_v30 }
  0xa9   :  { %v322_v33 = vpop.eup %321 }
  0xaa   :  { %v203_v36 = vmul.f32 %v322_v33, %v319_v32 }
  0xab   :  { %v168_v35 = vpop.f32.mrf.mxu3 }
  0xac   :  { %v186_v37 = vadd.f32 %v178_v34, %v168_v35  ;;  %v207_v38 = vsel %vm98_vm0, %v203_v36, 0.0 }
  0xad   :  { %v324_v39 = vpop.eup %323  ;;  %208 = vadd.xlane.f32.xlu0 %v207_v38 }
  0xae   :  { %v194_v40 = vadd.f32 %v318_v19, %v186_v37  ;;  %v326_v41 = vpop.eup %325  ;;  %v204_v43 = vmul.f32 %v324_v39, %v319_v32 }
  0xaf   :  { %v205_v42 = vmul.f32 %v326_v41, %v319_v32 }
  0xb0   :  { %327 = vtanh.f32 %v194_v40  ;;  %v210_v45 = vsel %vm98_vm0, %v204_v43, 0.0 }
  0xb1   :  { %v213_v44 = vsel %vm98_vm0, %v205_v42, 0.0 }
  0xb2   :  { %214 = vadd.xlane.f32.xlu1 %v213_v44 }
  0xb5   :  { %211 = vadd.xlane.f32.xlu0 %v210_v45 }
  0xb6   :  { %v328_v46 = vpop.eup %327 }
  0xb7   :  { %v206_v47 = vmul.f32 %v328_v46, %v319_v32 }
  0xb9   :  { %v216_v48 = vsel %vm98_vm0, %v206_v47, 0.0 }
  0xba   :  { %217 = vadd.xlane.f32.xlu2 %v216_v48 }
  0xcb   :  { %223 = vperm.xlu1 %316, %v320_v49  }
 0x120   :  { %v209_v50 = vpop.xlane.xlu0 %208 }
 0x125   :  { %v215_v51 = vpop.xlane.xlu1 %214 }
 0x128   :  { %v212_v53 = vpop.xlane.xlu0 %211 }
 0x12d   :  { %v218_v55 = vpop.xlane.xlu2 %217 }
 0x13d   :  { %v224_v56 = vpop.permute.xlu1 %223 }
 0x13e   :  { %v226_v57 = vadd.f32 %v224_v56, %v209_v50  ;;  %v227_v58 = vadd.f32 %v224_v56, %v212_v53  ;;  %v228_v59 = vadd.f32 %v224_v56, %v215_v51  ;;  %v229_v60 = vadd.f32 %v224_v56, %v218_v55 }
 0x140   :  { %v238_v62 = vperm.slane %v226_v57, %v237_v54  ;;  %v239_v63 = vperm.slane %v227_v58, %v237_v54  ;;  %v240_v0 = vperm.slane %v228_v59, %v237_v54  ;;  %v241_v1 = vperm.slane %v229_v60, %v237_v54 }
 0x142   :  { %v243_v2 = vsel %vm242_vm1, %v239_v63, %v238_v62 }
 0x143   :  { %v245_v3 = vsel %vm244_vm2, %v240_v0, %v243_v2 }
 0x144   :  { %v247_v4 = vsel %vm246_vm3, %v241_v1, %v245_v3 }
 0x145   :  { %v249_v5 = vsel %vm231_vm4, -1e+12, %v247_v4 }
 0x146   :  { %v251_v6 = vsel %vm250_vm5, %v249_v5, -inf }
 0x147   :  { %252 = vmax.xlane.f32.xlu2 %v251_v6 }
 0x1ba   :  { %v253_v7 = vpop.xlane.xlu2 %252 }
 0x1bb   :  { %v254_v8 = vsub.f32 %v249_v5, %v253_v7 }
 0x1bd   :  { %v255_v9 = vmul.f32 1.442695, %v254_v8 }
 0x1bf   :  { %329 = vpow2.f32 %v255_v9 }
 0x1c5   :  { %v330_v10 = vpop.eup %329 }
 0x1c6   :  { %v257_v11 = vsel %vm250_vm5, %v330_v10, 0.0 }
 0x1c7   :  { %258 = vadd.xlane.f32.xlu0 %v257_v11 }
 0x23a   :  { %v259_v12 = vpop.xlane.xlu0 %258 }
 0x23b   :  { %331 = vrcp.f32 %v259_v12  ;;  %v271_v16 = vand.u32 2147483648, %v259_v12  ;;  %v269_v18 = vand.u32 2147483647, %v259_v12  ;;  %vm265_vm7 = vweird.f32 %v259_v12 }
 0x23d   :  { %v272_v20 = vor.u32 1.1754944e-38, %v271_v16  ;;  %vm270_vm9 = vcmp.eq.f32.partialorder %v269_v18, 8.507059e+37 }
 0x241   :  { %v332_v13 = vpop.eup %331 }
 0x242   :  { %v261_v14 = vmul.f32 %v332_v13, %v259_v12  ;;  %vm266_vm6 = vweird.f32 %v332_v13 }
 0x243   :  { %vm267_vm8 = vmor %vm265_vm7, %vm266_vm6 }
 0x244   :  { %v262_v15 = vsub.f32 1.0, %v261_v14 }
 0x246   :  { %v263_v17 = vmul.f32 %v332_v13, %v262_v15 }
 0x248   :  { %v264_v19 = vadd.f32 %v332_v13, %v263_v17 }
 0x24a   :  { %v268_v21 = vsel %vm267_vm8, %v332_v13, %v264_v19 }
 0x24b   :  { %v273_v22 = vsel %vm270_vm9, %v272_v20, %v268_v21 }
 0x24c   :  { %v274_v23 = vmul.f32 %v330_v10, %v273_v22 }
 0x24e   :  { %275 = vst.msk [vmem:[#allocation11] sm:$0xf] %vm250_vm5, %v274_v23 }
 0x24f   :  { %286 = dma.vmem_to_hbm [thread:$0]  %s282_s28, 64, %s284_s9, [#allocation5]  }
 0x250   :  { %459 = dma.done.wait [#allocation5], 64  }
 0x251   :  { %460 = vsyncadd [#allocation5], 4294967232 }
 0x252   :  { %291 = vsyncpa [#allocation4], 1 }
 0x253   :  { %292 = vsyncpa [#allocation7], 1 }
 0x254   :  { %293 = vsyncpa [#allocation10], 1 }
 0x255   :  { %294 = vsyncpa [#allocation5], 1 }

</bundles_post_ra>
